<compile_context>
chip_gen: v6e
topology: v6e:2x2x1
jax: 0.10.0
libtpu: 0.0.40
codegen_flags: <defaults>
</compile_context>

<pallas_src>
import functools

import jax
import jax.numpy as jnp
from jax.experimental import pallas as pl
from jax.experimental.pallas import tpu as pltpu

_LANE = 128
_SUB = 32  # sublane quantum that is safe for f32 (8), bf16 (16) and int8 (32) blocks


def _pact_quant_kernel(params_ref, x_ref, o_ref, *, dequantize):
    # params_ref: SMEM f32[5] = [clip_val, clip_valn, scale, zero_point, inv_scale]
    clip_val = params_ref[0]
    clip_valn = params_ref[1]
    scale = params_ref[2]
    zero_point = params_ref[3]
    inv_scale = params_ref[4]

    x = x_ref[...].astype(jnp.float32)
    # Clamp with min/max (same NaN propagation as the torch.where formulation).
    y = jnp.minimum(x, clip_val)
    y = jnp.maximum(y, clip_valn)
    # linear_quantize: round(scale * y - zero_point)  (round-half-to-even == torch.round)
    q = jnp.round(scale * y - zero_point)
    if dequantize:
        # linear_dequantize: (q + zero_point) / scale  ==  (q + zero_point) * inv_scale
        q = (q + zero_point) * inv_scale
    o_ref[...] = q.astype(o_ref.dtype)


def _pact_params(clip_val, clip_valn, num_bits):
    """asymmetric_linear_quantization_params (integral_zero_point=False, signed=False),
    hoisted to scalar JAX in the wrapper. Returns f32[5]."""
    cv = clip_val.reshape(-1).astype(jnp.float32)[:1]
    cvn = clip_valn.reshape(-1).astype(jnp.float32)[:1]
    n = jnp.float32(2.0 ** num_bits - 1.0)
    sat_min = jnp.minimum(cvn, 0.0)
    sat_max = jnp.maximum(cv, 0.0)
    diff = sat_max - sat_min
    diff = jnp.where(diff == 0.0, n, diff)   # diff[diff == 0] = n
    scale = n / diff
    zero_point = scale * sat_min
    inv_scale = diff / n
    return jnp.concatenate([cv, cvn, scale, zero_point, inv_scale]).astype(jnp.float32)


def _pact_tail_jnp(x, params, dequantize):
    """Tiny (<128 element) tail path, fused by XLA — keeps semantics identical."""
    xf = x.astype(jnp.float32)
    y = jnp.minimum(xf, params[0])
    y = jnp.maximum(y, params[1])
    q = jnp.round(params[2] * y - params[3])
    if dequantize:
        q = (q + params[3]) * params[4]
    return q


def _run_slab(x2d, params, dequantize, out_dtype, tile_rows):
    rows, lane = x2d.shape
    # Tile rows: multiple of the sublane quantum, clamped for small inputs. A partial
    # final block (rows % trows != 0) is handled by Pallas OOB masking — no padding.
    rows_rounded = -(-rows // _SUB) * _SUB
    trows = min(tile_rows, rows_rounded)
    trows = -(-trows // _SUB) * _SUB

    kernel = functools.partial(_pact_quant_kernel, dequantize=dequantize)

    return pl.pallas_call(
        kernel,
        out_shape=jax.ShapeDtypeStruct((rows, lane), out_dtype),
        grid_spec=pltpu.PrefetchScalarGridSpec(
            num_scalar_prefetch=0,
            grid=(pl.cdiv(rows, trows),),
            in_specs=[
                pl.BlockSpec(memory_space=pltpu.MemorySpace.SMEM),   # params f32[5]
                pl.BlockSpec((trows, lane), lambda i: (i, 0)),       # x tile (native dtype)
            ],
            out_specs=pl.BlockSpec((trows, lane), lambda i: (i, 0)),
        ),
        compiler_params=pltpu.CompilerParams(
            dimension_semantics=("parallel",),          # megacore split on v7x
            vmem_limit_bytes=32 * 1024 * 1024,          # safe on v5e/v6e/v7x
        ),
    )(params, x2d)


def learned_twosided_clipped_linear_quantize(x, clip_val, clip_valn, num_bits,
                                             dequantize=True, *, out_dtype=None,
                                             tile_rows=8192):
    """Forward pass of LearnedTwosidedClippedLinearQuantization.

    x: any-shape float array (e.g. NCHW activations), any float dtype.
    clip_val, clip_valn: shape-[1] learned parameters (pos / neg clip).
    out_dtype: optional output dtype override (e.g. jnp.int8 when dequantize=False
               to halve+ write bandwidth). Default: same dtype as x (module semantics).
    """
    orig_shape = x.shape
    if out_dtype is None:
        out_dtype = x.dtype

    params = _pact_params(clip_val, clip_valn, num_bits)

    x_flat = x.reshape(-1)            # contiguous reshape — free
    total = x_flat.shape[0]
    rem = total % _LANE
    main = total - rem

    if rem == 0:
        out2d = _run_slab(x_flat.reshape(total // _LANE, _LANE),
                          params, dequantize, out_dtype, tile_rows)
        return out2d.reshape(orig_shape)

    # Rare unaligned path: kernel on the 128-aligned prefix, tiny jnp tail, one concat.
    # TODO(synk): a fully copy-free tail would need a manual HBM DMA epilogue; the
    # <128-element tail + single concat is already far cheaper than pad + post-slice.
    pieces = []
    if main > 0:
        main_out = _run_slab(x_flat[:main].reshape(main // _LANE, _LANE),
                             params, dequantize, out_dtype, tile_rows)
        pieces.append(main_out.reshape(-1))
    tail_out = _pact_tail_jnp(x_flat[main:], params, dequantize).astype(out_dtype)
    pieces.append(tail_out)
    return jnp.concatenate(pieces).reshape(orig_shape)


def _reference(x, clip_val, clip_valn, num_bits, dequantize=True):
    """Pure-JAX reimplementation of the PyTorch forward for verification."""
    x = x.astype(jnp.float32)
    cv = clip_val.astype(jnp.float32)[0]
    cvn = clip_valn.astype(jnp.float32)[0]
    n = 2.0 ** num_bits - 1.0
    sat_min = jnp.minimum(cvn, 0.0)
    sat_max = jnp.maximum(cv, 0.0)
    diff = sat_max - sat_min
    diff = jnp.where(diff == 0.0, n, diff)
    scale = n / diff
    zp = scale * sat_min
    y = jnp.where(x > cv, cv, x)
    y = jnp.where(y < cvn, cvn, y)
    q = jnp.round(scale * y - zp)
    if dequantize:
        q = (q + zp) / scale
    return q


if __name__ == "__main__":
    key = jax.random.PRNGKey(0)
    k1, k2 = jax.random.split(key)

    # Module-style deterministic parameters (num_bits=4, init_clip_valn=-2.0, init_clip_val=2.0)
    num_bits = 4
    clip_val = jnp.array([2.0], dtype=jnp.float32)     # nn.Parameter(torch.Tensor([2.0]))
    clip_valn = jnp.array([-2.0], dtype=jnp.float32)   # nn.Parameter(torch.Tensor([-2.0]))

    # 1) Aligned NCHW activation input (common case)
    x = jax.random.normal(k1, (2, 4, 16, 16), dtype=jnp.float32) * 3.0
    out = learned_twosided_clipped_linear_quantize(x, clip_val, clip_valn, num_bits,
                                                   dequantize=True)
    out = jax.block_until_ready(out)
    ref = _reference(x, clip_val, clip_valn, num_bits, dequantize=True)
    assert out.shape == x.shape and out.dtype == x.dtype
    # reciprocal-multiply dequantize can differ from a true divide by ~1 ulp
    assert jnp.allclose(out, ref, atol=1e-5, rtol=1e-5), "mismatch vs reference (aligned)"

    # 2) Unaligned element count (numel % 128 != 0) — exercises the no-pad tail path
    x_u = jax.random.normal(k2, (3, 5, 7, 11), dtype=jnp.float32) * 3.0
    out_u = jax.block_until_ready(
        learned_twosided_clipped_linear_quantize(x_u, clip_val, clip_valn, num_bits,
                                                 dequantize=True))
    ref_u = _reference(x_u, clip_val, clip_valn, num_bits, dequantize=True)
    assert out_u.shape == x_u.shape and out_u.dtype == x_u.dtype
    assert jnp.allclose(out_u, ref_u, atol=1e-5, rtol=1e-5), "mismatch vs reference (unaligned)"

    # 3) dequantize=False with narrow int8 output codes (write-bandwidth saving)
    x_q = jax.random.normal(key, (2, 4, 32, 16), dtype=jnp.float32) * 3.0
    out_q = jax.block_until_ready(
        learned_twosided_clipped_linear_quantize(x_q, clip_val, clip_valn, num_bits,
                                                 dequantize=False, out_dtype=jnp.int8))
    ref_q = _reference(x_q, clip_val, clip_valn, num_bits, dequantize=False)
    assert out_q.dtype == jnp.int8
    assert jnp.array_equal(out_q.astype(jnp.int32),
                           ref_q.astype(jnp.int32)), "mismatch vs reference (int8 codes)"

    print("KERNEL_OK")
</pallas_src>

<mosaic_0001>
module attributes {stable_mosaic.version = 11 : i64} {
  func.func @_pact_quant_kernel(%arg0: i32, %arg1: memref<5xf32, #tpu.memory_space<smem>>, %arg2: memref<32x128xf32, #tpu.memory_space<vmem>>, %arg3: memref<32x128xf32, #tpu.memory_space<vmem>>) attributes {dimension_semantics = [#tpu.dimension_semantics<parallel>], iteration_bounds = array<i64: 1>, scalar_prefetch = 0 : i64, scratch_operands = 0 : i64, tpu.core_type = #tpu.core_type<tc>, window_params = [{transform_indices = @transform_0, window_bounds = array<i64: 5>}, {transform_indices = @transform_1, window_bounds = array<i64: 32, 128>}, {transform_indices = @transform_2, window_bounds = array<i64: 32, 128>}]} {
    %c0 = arith.constant 0 : index
    %0 = memref.load %arg1[%c0] : memref<5xf32, #tpu.memory_space<smem>>
    %c1 = arith.constant 1 : index
    %1 = memref.load %arg1[%c1] : memref<5xf32, #tpu.memory_space<smem>>
    %c2 = arith.constant 2 : index
    %2 = memref.load %arg1[%c2] : memref<5xf32, #tpu.memory_space<smem>>
    %c3 = arith.constant 3 : index
    %3 = memref.load %arg1[%c3] : memref<5xf32, #tpu.memory_space<smem>>
    %c4 = arith.constant 4 : index
    %4 = memref.load %arg1[%c4] : memref<5xf32, #tpu.memory_space<smem>>
    %c0_0 = arith.constant 0 : index
    %c0_1 = arith.constant 0 : index
    %5 = vector.load %arg2[%c0_0, %c0_1] : memref<32x128xf32, #tpu.memory_space<vmem>>, vector<32x128xf32>
    %6 = vector.broadcast %0 : f32 to vector<32x128xf32>
    %7 = arith.minimumf %5, %6 : vector<32x128xf32>
    %8 = vector.broadcast %1 : f32 to vector<32x128xf32>
    %9 = arith.maximumf %7, %8 : vector<32x128xf32>
    %10 = vector.broadcast %2 : f32 to vector<32x128xf32>
    %11 = arith.mulf %10, %9 : vector<32x128xf32>
    %12 = vector.broadcast %3 : f32 to vector<32x128xf32>
    %13 = arith.subf %11, %12 : vector<32x128xf32>
    %14 = math.roundeven %13 : vector<32x128xf32>
    %15 = vector.broadcast %3 : f32 to vector<32x128xf32>
    %16 = arith.addf %14, %15 : vector<32x128xf32>
    %17 = vector.broadcast %4 : f32 to vector<32x128xf32>
    %18 = arith.mulf %16, %17 : vector<32x128xf32>
    %c0_2 = arith.constant 0 : index
    %c0_3 = arith.constant 0 : index
    %19 = vector.load %arg3[%c0_2, %c0_3] : memref<32x128xf32, #tpu.memory_space<vmem>>, vector<32x128xf32>
    tpu.vector_store %arg3[%c0_2, %c0_3], %18 {strides = array<i32>} : memref<32x128xf32, #tpu.memory_space<vmem>>, vector<32x128xf32>,
    return
  }
  func.func @transform_0(%arg0: i32) -> i32 {
    %c0_i32 = arith.constant 0 : i32
    %c0_i32_0 = arith.constant 0 : i32
    return %c0_i32 : i32
  }
  func.func @transform_1(%arg0: i32) -> (i32, i32) {
    %c0_i32 = arith.constant 0 : i32
    %c0_i32_0 = arith.constant 0 : i32
    return %arg0, %c0_i32 : i32, i32
  }
  func.func @transform_2(%arg0: i32) -> (i32, i32) {
    %c0_i32 = arith.constant 0 : i32
    %c0_i32_0 = arith.constant 0 : i32
    return %arg0, %c0_i32 : i32, i32
  }
}

</mosaic_0001>

<bundles_post_ra>
// kernel: tpu_custom_call.1
= control target key start
LH: loop header
LB: loop body
LE: loop exit
PB: predicated region body
PF: predicated region fallthrough
CT: control target
= control target key end

     0   :  { %7 = vsyncpa [#allocation5], 0  ;;  %s243_s0 = inlined_call_operand.hbm [shape: f32[5], index: 0, kind: input, shape index: {}]   ;;  %s244_s1 = inlined_call_operand.hbm [shape: f32[16,128], index: 1, kind: input, shape index: {}]   ;;  %s245_s2 = inlined_call_operand.hbm [shape: f32[16,128], index: 2, kind: output, shape index: {}]  }
   0x1   :  { %8 = vsyncpa [#allocation3], 0 }
   0x2   :  { %9 = vsyncpa [#allocation4], 0  ;;  %s196_s9 = smov [#allocation2]  }
   0x3   :  { %17 = dma.hbm_to_smem %s243_s0, 16, %s196_s9, [#allocation5]  }
   0x4   :  { %22 = vsyncadd [#allocation3], 256  ;;  %s197_s12 = smov [#allocation6]  }
   0x5   :  { %s23_s13 = sshll.u32 %s197_s12, 4  ;;  %s24_s13 = int_to_ptr.vmem [resolvable:$true] %s23_s13 }
   0x6   :  { %s158_s14 = scalar_lea.vmem %s24_s13, 256  ;;  %s162_s15 = scalar_lea.vmem %s24_s13, 512 }
   0x7   :  { %p159_p0 = scmp.ne.s32.totalorder %s24_s13, %s158_s14  ;;  %p163_p1 = scmp.lt.s32.totalorder %s24_s13, %s24_s13 }
   0x8   :  { %p164_p2 = scmp.lt.s32.totalorder %s162_s15, %s158_s14 }
   0xa   :  { %p165_p3 = por %p164_p2, %p163_p1 }
   0xc   :  { %p166_p4 = pnand %p165_p3, %p159_p0 }
   0xe   :  { %169 = shalt.err (!%p166_p4)
}
   0xf   :  { %s198_s16 = smov 128   ;;  %s199_s17 = smov 8  }
  0x10   :  { %29 = dma.hbm_to_vmem [thread:$0]  %s244_s1, 256, %s24_s13, [#allocation3], %s198_s16, %s198_s16, %s199_s17  }
  0x11   :  { %190 = dma.done.wait [#allocation5], 16  }
  0x12   :  { %191 = vsyncadd [#allocation5], 4294967280 }
  0x13   :  { %192 = dma.done.wait [#allocation3], 512  }
  0x14   :  { %193 = vsyncadd [#allocation3], 4294966784 }
  0x15   :  { %36 = sfence }
  0x16   :  { %s37_s0 = sld [smem:[#allocation2]]  ;;  %v42_v0 = vld [vmem:[#allocation6] sm:$0xff]  ;;  %v43_v1 = vld [vmem:[#allocation6 + $0x8] sm:$0xff]  ;;  %v44_v2 = vld [vmem:[#allocation6 + $0x10] sm:$0xff] }
  0x17   :  { %s101_s20 = sld [smem:[#allocation2 + $0x1]]  ;;  %v45_v3 = vld [vmem:[#allocation6 + $0x18] sm:$0xff] }
  0x18   :  { %s102_s21 = sld [smem:[#allocation2 + $0x2]] }
  0x19   :  { %s103_s22 = sld [smem:[#allocation2 + $0x3]] }
  0x1a   :  { %s104_s1 = sld [smem:[#allocation2 + $0x4]] }
  0x1c   :  { %v46_v4 = vstv %s37_s0 }
  0x1d   :  { %v47_v5 = vmin.f32 %v42_v0, %v46_v4  ;;  %v51_v6 = vstv %s101_s20  ;;  %v48_v7 = vmin.f32 %v43_v1, %v46_v4  ;;  %v49_v8 = vmin.f32 %v44_v2, %v46_v4 }
  0x1e   :  { %v56_v9 = vstv %s102_s21  ;;  %v50_v10 = vmin.f32 %v45_v3, %v46_v4 }
  0x1f   :  { %v52_v11 = vmax.f32 %v47_v5, %v51_v6  ;;  %v53_v12 = vmax.f32 %v48_v7, %v51_v6  ;;  %v54_v13 = vmax.f32 %v49_v8, %v51_v6  ;;  %v61_v14 = vstv %s103_s22 }
  0x20   :  { %v55_v15 = vmax.f32 %v50_v10, %v51_v6  ;;  %v74_v49 = vstv %s104_s1 }
  0x21   :  { %v57_v16 = vmul.f32 %v56_v9, %v52_v11  ;;  %v58_v17 = vmul.f32 %v56_v9, %v53_v12  ;;  %v59_v18 = vmul.f32 %v56_v9, %v54_v13 }
  0x22   :  { %v60_v19 = vmul.f32 %v56_v9, %v55_v15 }
  0x23   :  { %v62_v20 = vsub.f32 %v57_v16, %v61_v14  ;;  %v63_v21 = vsub.f32 %v58_v17, %v61_v14  ;;  %v64_v22 = vsub.f32 %v59_v18, %v61_v14 }
  0x24   :  { %v65_v26 = vsub.f32 %v60_v19, %v61_v14 }
  0x25   :  { %v105_v23 = vand.u32 2147483647, %v62_v20  ;;  %v107_v24 = vcvt.f32.s32 %v62_v20  ;;  %v113_v25 = vand.u32 2147483647, %v63_v21  ;;  %v115_v27 = vcvt.f32.s32 %v63_v21 }
  0x26   :  { %v123_v28 = vcvt.f32.s32 %v64_v22  ;;  %v110_v30 = vand.u32 2147483648, %v62_v20  ;;  %v121_v31 = vand.u32 2147483647, %v64_v22  ;;  %v118_v33 = vand.u32 2147483648, %v63_v21 }
  0x27   :  { %v108_v29 = vcvt.s32.f32 %v107_v24  ;;  %v116_v32 = vcvt.s32.f32 %v115_v27  ;;  %v126_v35 = vand.u32 2147483648, %v64_v22  ;;  %vm225_vm0 = vcmp.lt.f32.partialorder %v105_v23, 8388608.0 }
  0x28   :  { %v124_v34 = vcvt.s32.f32 %v123_v28  ;;  %vm229_vm1 = vcmp.lt.f32.partialorder %v113_v25, 8388608.0  ;;  %v131_v39 = vcvt.f32.s32 %v65_v26  ;;  %v129_v42 = vand.u32 2147483647, %v65_v26 }
  0x29   :  { %v109_v37 = vand.u32 2147483647, %v108_v29  ;;  %v117_v40 = vand.u32 2147483647, %v116_v32  ;;  %vm122_vm2 = vcmp.lt.f32.partialorder %v121_v31, 8388608.0  ;;  %v134_v45 = vand.u32 2147483648, %v65_v26 }
  0x2a   :  { %v125_v41 = vand.u32 2147483647, %v124_v34  ;;  %v132_v44 = vcvt.s32.f32 %v131_v39  ;;  %vm130_vm3 = vcmp.lt.f32.partialorder %v129_v42, 8388608.0 }
  0x2b   :  { %v111_v43 = vor.u32 %v110_v30, %v109_v37  ;;  %v119_v46 = vor.u32 %v118_v33, %v117_v40 }
  0x2c   :  { %v127_v47 = vor.u32 %v126_v35, %v125_v41  ;;  %v133_v50 = vand.u32 2147483647, %v132_v44 }
  0x2d   :  { %v112_v48 = vsel %vm225_vm0, %v111_v43, %v62_v20  ;;  %v120_v52 = vsel %vm229_vm1, %v119_v46, %v63_v21 }
  0x2e   :  { %v70_v51 = vadd.f32 %v112_v48, %v61_v14  ;;  %v128_v53 = vsel %vm122_vm2, %v127_v47, %v64_v22  ;;  %v71_v54 = vadd.f32 %v120_v52, %v61_v14  ;;  %v135_v56 = vor.u32 %v134_v45, %v133_v50 }
  0x2f   :  { %v72_v55 = vadd.f32 %v128_v53, %v61_v14 }
  0x30   :  { %v75_v57 = vmul.f32 %v74_v49, %v70_v51  ;;  %v76_v58 = vmul.f32 %v74_v49, %v71_v54  ;;  %v136_v60 = vsel %vm130_vm3, %v135_v56, %v65_v26 }
  0x31   :  { %v77_v59 = vmul.f32 %v74_v49, %v72_v55  ;;  %v73_v61 = vadd.f32 %v136_v60, %v61_v14 }
  0x32   :  { %79 = vst [vmem:[#allocation7] sm:$0xff] %v75_v57  ;;  %80 = vst [vmem:[#allocation7 + $0x8] sm:$0xff] %v76_v58 }
  0x33   :  { %81 = vst [vmem:[#allocation7 + $0x10] sm:$0xff] %v77_v59  ;;  %v78_v62 = vmul.f32 %v74_v49, %v73_v61 }
  0x35   :  { %82 = vst [vmem:[#allocation7 + $0x18] sm:$0xff] %v78_v62 }
  0x36   :  { %87 = vsyncadd [#allocation4], 256  ;;  %s200_s23 = smov [#allocation7]  }
  0x37   :  { %s88_s24 = sshll.u32 %s200_s23, 4  ;;  %s89_s24 = int_to_ptr.vmem [resolvable:$true] %s88_s24 }
  0x38   :  { %s170_s25 = scalar_lea.vmem %s89_s24, 256  ;;  %s174_s26 = scalar_lea.vmem %s89_s24, 512 }
  0x39   :  { %p171_p5 = scmp.ne.s32.totalorder %s89_s24, %s170_s25  ;;  %p175_p6 = scmp.lt.s32.totalorder %s89_s24, %s89_s24 }
  0x3a   :  { %p176_p7 = scmp.lt.s32.totalorder %s174_s26, %s170_s25 }
  0x3c   :  { %p177_p8 = por %p176_p7, %p175_p6 }
  0x3e   :  { %p178_p9 = pnand %p177_p8, %p171_p5 }
  0x40   :  { %181 = shalt.err (!%p178_p9)
}
  0x41   :  { %94 = dma.vmem_to_hbm [thread:$0]  %s89_s24, 256, %s245_s2, [#allocation4], %s198_s16, %s198_s16, %s199_s17  }
  0x42   :  { %194 = dma.done.wait [#allocation4], 512  }
  0x43   :  { %195 = vsyncadd [#allocation4], 4294966784 }
  0x44   :  { %98 = vsyncpa [#allocation3], 1 }
  0x45   :  { %99 = vsyncpa [#allocation4], 1 }
  0x46   :  { %100 = vsyncpa [#allocation5], 1 }

</bundles_post_ra>
